<compile_context>
chip_gen: v7x
topology: tpu7x:2x2x1
jax: 0.10.0
libtpu: 0.0.40
codegen_flags: <defaults>
</compile_context>

<pallas_src>
import jax
import jax.numpy as jnp
from jax.experimental import pallas as pl
from jax.experimental.pallas import tpu as pltpu

_MiB = 1024 * 1024
_VMEM_TILING_BUDGET = 24 * _MiB  # design budget: streamed tiles + resident params


# ------------------------------- kernels -------------------------------------

def _affine_scalar_kernel(logits_ref, alpha_ref, beta_ref, out_ref):
    # logits_ref: [TN, Cb]; alpha_ref: SMEM scalar (1,); beta_ref: [1, Cb].
    x = logits_ref[...]
    a = alpha_ref[0].astype(x.dtype)          # single scalar cast, stays on VPU dtype
    out_ref[...] = (x * a + beta_ref[...]).astype(out_ref.dtype)


def _affine_vector_kernel(logits_ref, alpha_ref, beta_ref, out_ref):
    # logits_ref: [TN, Cb]; alpha_ref / beta_ref: [1, Cb] (row broadcast).
    out_ref[...] = (logits_ref[...] * alpha_ref[...]
                    + beta_ref[...]).astype(out_ref.dtype)


def _affine_matrix_kernel(logits_ref, alpha_t_ref, beta_ref, out_ref):
    # logits_ref: [TN, C]; alpha_t_ref: [C, TC] (= alpha.T block); beta_ref: [1, TC].
    acc = jnp.dot(logits_ref[...], alpha_t_ref[...],
                  preferred_element_type=jnp.float32)
    out_ref[...] = (acc + beta_ref[...].astype(jnp.float32)).astype(out_ref.dtype)


# ------------------------------- helpers --------------------------------------

def _round_up(x: int, m: int) -> int:
    return -(-x // m) * m


def _row_packing(itemsize: int) -> int:
    # Sublane packing: f32 -> 8, bf16 -> 16, int8/fp8 -> 32.
    return 8 * max(1, 4 // itemsize)


def _vmem_limit(footprint_bytes: int) -> int:
    # Enforce the budget explicitly instead of relying on per-generation
    # scoped-VMEM defaults (16 MiB v5e, 32 MiB v6e/v7x).
    return int(min(64 * _MiB, max(32 * _MiB, footprint_bytes + 4 * _MiB)))


def _pick_tile_rows(n_rows: int, row_mult: int, bytes_per_row: int,
                    avail_bytes: int) -> int:
    """Largest row tile fitting `avail_bytes`, rounded to the sublane packing.
    If the whole array would be a single grid step, split in two so the
    'parallel' axis can still be sharded across v7x's two TensorCores."""
    tn = int(avail_bytes // max(bytes_per_row, 1))
    tn = max(row_mult, (tn // row_mult) * row_mult)
    if tn >= n_rows:
        if n_rows >= 2 * row_mult:
            tn = _round_up(pl.cdiv(n_rows, 2), row_mult)
        else:
            tn = max(n_rows, 1)   # full-extent block (tiny inputs)
    return tn


# ------------------------------- wrapper ---------------------------------------

class AffineCalibrator:
    """JAX/Pallas re-implementation of the PyTorch AffineCalibrator forward."""

    _SCALAR_ALPHA = ('dp_calibration', 'temp_scaling', 'bias_shift')

    def __init__(self, method: str, num_classes: int):
        if method not in ('dp_calibration', 'vector_scaling', 'temp_scaling',
                          'bias_shift', 'matrix_scaling'):
            raise ValueError(f'Invalid method: {method}')
        self.method = method
        self.num_classes = num_classes
        if method == 'matrix_scaling':
            self.alpha = jnp.eye(num_classes, dtype=jnp.float32)
        elif method == 'vector_scaling':
            self.alpha = jnp.ones((num_classes,), dtype=jnp.float32)
        else:
            self.alpha = jnp.ones((1,), dtype=jnp.float32)
        self.beta = jnp.zeros((num_classes,), dtype=jnp.float32)

    def __call__(self, logits):
        logits = jnp.asarray(logits)
        N, C = logits.shape
        if self.method == 'matrix_scaling':
            return self._forward_matrix(logits, N, C)
        return self._forward_elementwise(logits, N, C)

    # ----------------------- elementwise (VPU) path ---------------------------

    def _forward_elementwise(self, logits, N, C):
        dtype = logits.dtype
        itemsize = jnp.dtype(dtype).itemsize
        row_mult = _row_packing(itemsize)
        scalar_alpha = self.method in self._SCALAR_ALPHA

        # TODO(synk): PyTorch type promotion would keep an f32 output for bf16
        # logits; we pre-cast params to the logits dtype for a pure VALU path.
        beta = jnp.asarray(self.beta, dtype=dtype)
        alpha = jnp.asarray(self.alpha, dtype=dtype)

        # Lane-fold small class counts: [N, C] -> [N*C//128, 128] (free,
        # contiguous reshape) so stores are unmasked lane-dense vst.  Otherwise
        # keep the class axis at full extent (no host pad / slice copies).
        fold = 1
        if C < 128 and 128 % C == 0 and N % (128 // C) == 0 and N * C >= 128:
            fold = 128 // C

        if fold > 1:
            x = logits.reshape(N // fold, C * fold)
            beta_row = jnp.tile(beta, fold).reshape(1, C * fold)
            alpha_row = None if scalar_alpha else jnp.tile(alpha, fold).reshape(1, C * fold)
        else:
            x = logits
            beta_row = beta.reshape(1, C)
            alpha_row = None if scalar_alpha else alpha.reshape(1, C)

        n_rows, n_cols = x.shape
        lane_cols = _round_up(n_cols, 128)                 # VMEM lane layout width
        bytes_per_row = 4 * lane_cols * itemsize           # dbl-buffered in + out
        tn = _pick_tile_rows(n_rows, row_mult, bytes_per_row, _VMEM_TILING_BUDGET)
        num_tiles = pl.cdiv(n_rows, tn)

        footprint = (4 * _round_up(tn, row_mult) * lane_cols * itemsize
                     + 4 * 8 * lane_cols * itemsize)       # + alpha/beta rows
        compiler_params = pltpu.CompilerParams(
            dimension_semantics=("parallel",),
            vmem_limit_bytes=_vmem_limit(footprint))
        cost = pl.CostEstimate(flops=2 * N * C, transcendentals=0,
                               bytes_accessed=(2 * N * C + 2 * C) * itemsize)

        x_spec = pl.BlockSpec((tn, n_cols), lambda i: (i, 0))
        row_spec = pl.BlockSpec((1, n_cols), lambda i: (0, 0))
        out_spec = pl.BlockSpec((tn, n_cols), lambda i: (i, 0))
        out_shape = jax.ShapeDtypeStruct((n_rows, n_cols), dtype)

        if scalar_alpha:
            out = pl.pallas_call(
                _affine_scalar_kernel,
                out_shape=out_shape,
                grid=(num_tiles,),
                in_specs=[x_spec,
                          pl.BlockSpec(memory_space=pltpu.MemorySpace.SMEM),
                          row_spec],
                out_specs=out_spec,
                compiler_params=compiler_params,
                cost_estimate=cost,
            )(x, jnp.asarray(self.alpha, dtype=jnp.float32).reshape(1), beta_row)
        else:
            out = pl.pallas_call(
                _affine_vector_kernel,
                out_shape=out_shape,
                grid=(num_tiles,),
                in_specs=[x_spec, row_spec, row_spec],
                out_specs=out_spec,
                compiler_params=compiler_params,
                cost_estimate=cost,
            )(x, alpha_row, beta_row)

        return out.reshape(N, C) if fold > 1 else out

    # ------------------------- matrix (MXU) path ------------------------------

    def _forward_matrix(self, logits, N, C):
        dtype = logits.dtype
        itemsize = jnp.dtype(dtype).itemsize
        row_mult = _row_packing(itemsize)

        # Params pre-cast to the logits dtype: bf16 logits use the MXU at
        # native width and halve resident alpha footprint.
        alpha_t = jnp.asarray(self.alpha, dtype=dtype).T
        beta_row = jnp.asarray(self.beta, dtype=dtype).reshape(1, C)

        c_lane = _round_up(C, 128)
        c_sub = _round_up(C, row_mult)

        # alpha.T column tiling: single full-extent block when small; otherwise
        # 128-multiple column tiles so resident VMEM scales with C*TC, not C^2
        # (matters on v7x's 64 MiB physical / v5e's 16 MiB scoped VMEM).
        alpha_budget = 8 * _MiB
        if 2 * c_sub * c_lane * itemsize <= alpha_budget:
            tc = C
        else:
            tc = max(128, (alpha_budget // (2 * c_sub * itemsize)) // 128 * 128)
            tc = min(tc, c_lane)
        tc_lane = _round_up(tc, 128)
        num_col_tiles = pl.cdiv(C, tc)
        reserved = 2 * c_sub * tc_lane * itemsize + 2 * 8 * tc_lane * itemsize

        bytes_per_row = 2 * (c_lane + tc_lane) * itemsize  # dbl-buffered in + out
        avail = max(_VMEM_TILING_BUDGET - reserved, 2 * _MiB)
        tn = _pick_tile_rows(N, row_mult, bytes_per_row, avail)
        num_row_tiles = pl.cdiv(N, tn)

        footprint = _round_up(tn, row_mult) * bytes_per_row + reserved
        compiler_params = pltpu.CompilerParams(
            dimension_semantics=("parallel", "parallel"),
            vmem_limit_bytes=_vmem_limit(footprint))
        cost = pl.CostEstimate(flops=2 * N * C * C, transcendentals=0,
                               bytes_accessed=(2 * N * C + C * C + C) * itemsize)

        return pl.pallas_call(
            _affine_matrix_kernel,
            out_shape=jax.ShapeDtypeStruct((N, C), dtype),
            grid=(num_row_tiles, num_col_tiles),
            in_specs=[pl.BlockSpec((tn, C), lambda i, j: (i, 0)),
                      pl.BlockSpec((C, tc), lambda i, j: (0, j)),
                      pl.BlockSpec((1, tc), lambda i, j: (0, j))],
            out_specs=pl.BlockSpec((tn, tc), lambda i, j: (i, j)),
            compiler_params=compiler_params,
            cost_estimate=cost,
        )(logits, alpha_t, beta_row)


# --------------------------------- main -----------------------------------------

if __name__ == "__main__":
    key = jax.random.PRNGKey(0)
    k_logits, k_alpha_v, k_alpha_m, k_beta, k_logits2 = jax.random.split(key, 5)

    N, C = 8, 16  # batch, num_classes
    logits = jax.random.normal(k_logits, (N, C), dtype=jnp.float32)

    ok = True

    # 1) vector_scaling: per-class alpha/beta (lane-folded VPU path).
    cal_v = AffineCalibrator('vector_scaling', C)
    cal_v.alpha = 1.0 + 0.1 * jax.random.normal(k_alpha_v, (C,), dtype=jnp.float32)
    cal_v.beta = 0.1 * jax.random.normal(k_beta, (C,), dtype=jnp.float32)
    out_v = jax.block_until_ready(cal_v(logits))
    ok &= bool(jnp.allclose(out_v, logits * cal_v.alpha + cal_v.beta,
                            atol=1e-5, rtol=1e-5))

    # 2) temp_scaling: scalar alpha (SMEM path), fixed zero beta.
    cal_t = AffineCalibrator('temp_scaling', C)
    cal_t.alpha = jnp.array([0.7], dtype=jnp.float32)
    out_t = jax.block_until_ready(cal_t(logits))
    ok &= bool(jnp.allclose(out_t, logits * cal_t.alpha + cal_t.beta,
                            atol=1e-5, rtol=1e-5))

    # 3) bias_shift: scalar alpha = 1, per-class beta (SMEM path).
    cal_b = AffineCalibrator('bias_shift', C)
    cal_b.beta = 0.2 * jax.random.normal(k_beta, (C,), dtype=jnp.float32)
    out_b = jax.block_until_ready(cal_b(logits))
    ok &= bool(jnp.allclose(out_b, logits * cal_b.alpha + cal_b.beta,
                            atol=1e-5, rtol=1e-5))

    # 4) matrix_scaling: logits @ alpha.T + beta (MXU path).
    cal_m = AffineCalibrator('matrix_scaling', C)
    cal_m.alpha = jnp.eye(C, dtype=jnp.float32) + \
        0.05 * jax.random.normal(k_alpha_m, (C, C), dtype=jnp.float32)
    cal_m.beta = 0.1 * jax.random.normal(k_beta, (C,), dtype=jnp.float32)
    out_m = jax.block_until_ready(cal_m(logits))
    ok &= bool(jnp.allclose(out_m, logits @ cal_m.alpha.T + cal_m.beta,
                            atol=1e-4, rtol=1e-4))

    # 5) Ragged / non-folding shapes (N=20, C=20): last row block is masked by
    #    the pipeline, class axis stays full-extent, no host pad/slice copies.
    N2, C2 = 20, 20
    logits2 = jax.random.normal(k_logits2, (N2, C2), dtype=jnp.float32)
    cal_v2 = AffineCalibrator('vector_scaling', C2)
    cal_v2.alpha = 1.0 + 0.1 * jax.random.normal(k_alpha_v, (C2,), dtype=jnp.float32)
    cal_v2.beta = 0.1 * jax.random.normal(k_beta, (C2,), dtype=jnp.float32)
    out_v2 = jax.block_until_ready(cal_v2(logits2))
    ok &= bool(jnp.allclose(out_v2, logits2 * cal_v2.alpha + cal_v2.beta,
                            atol=1e-5, rtol=1e-5))

    cal_m2 = AffineCalibrator('matrix_scaling', C2)
    cal_m2.alpha = jnp.eye(C2, dtype=jnp.float32) + \
        0.05 * jax.random.normal(k_alpha_m, (C2, C2), dtype=jnp.float32)
    cal_m2.beta = 0.1 * jax.random.normal(k_beta, (C2,), dtype=jnp.float32)
    out_m2 = jax.block_until_ready(cal_m2(logits2))
    ok &= bool(jnp.allclose(out_m2, logits2 @ cal_m2.alpha.T + cal_m2.beta,
                            atol=1e-4, rtol=1e-4))

    if ok:
        print("KERNEL_OK")
    else:
        raise SystemExit("mismatch vs reference")
</pallas_src>

<mosaic_0001>
module attributes {stable_mosaic.version = 11 : i64} {
  func.func @_affine_vector_kernel(%arg0: i32, %arg1: memref<1x128xf32, #tpu.memory_space<vmem>>, %arg2: memref<1x128xf32, #tpu.memory_space<vmem>>, %arg3: memref<1x128xf32, #tpu.memory_space<vmem>>, %arg4: memref<1x128xf32, #tpu.memory_space<vmem>>) attributes {dimension_semantics = [#tpu.dimension_semantics<parallel>], iteration_bounds = array<i64: 1>, scalar_prefetch = 0 : i64, scratch_operands = 0 : i64, tpu.core_type = #tpu.core_type<tc>, window_params = [{transform_indices = @transform_0, window_bounds = array<i64: 1, 128>}, {pipeline_mode = #tpu.pipeline_mode<synchronous>, transform_indices = @transform_1, window_bounds = array<i64: 1, 128>}, {pipeline_mode = #tpu.pipeline_mode<synchronous>, transform_indices = @transform_2, window_bounds = array<i64: 1, 128>}, {transform_indices = @transform_3, window_bounds = array<i64: 1, 128>}]} {
    %c0 = arith.constant 0 : index
    %c0_0 = arith.constant 0 : index
    %0 = vector.load %arg1[%c0, %c0_0] : memref<1x128xf32, #tpu.memory_space<vmem>>, vector<1x128xf32>
    %c0_1 = arith.constant 0 : index
    %c0_2 = arith.constant 0 : index
    %1 = vector.load %arg2[%c0_1, %c0_2] : memref<1x128xf32, #tpu.memory_space<vmem>>, vector<1x128xf32>
    %2 = arith.mulf %0, %1 : vector<1x128xf32>
    %c0_3 = arith.constant 0 : index
    %c0_4 = arith.constant 0 : index
    %3 = vector.load %arg3[%c0_3, %c0_4] : memref<1x128xf32, #tpu.memory_space<vmem>>, vector<1x128xf32>
    %4 = arith.addf %2, %3 : vector<1x128xf32>
    %c0_5 = arith.constant 0 : index
    %c0_6 = arith.constant 0 : index
    %5 = vector.load %arg4[%c0_5, %c0_6] : memref<1x128xf32, #tpu.memory_space<vmem>>, vector<1x128xf32>
    tpu.vector_store %arg4[%c0_5, %c0_6], %4 {strides = array<i32>} : memref<1x128xf32, #tpu.memory_space<vmem>>, vector<1x128xf32>,
    return
  }
  func.func @transform_0(%arg0: i32) -> (i32, i32) {
    %c0_i32 = arith.constant 0 : i32
    %c0_i32_0 = arith.constant 0 : i32
    return %arg0, %c0_i32 : i32, i32
  }
  func.func @transform_1(%arg0: i32) -> (i32, i32) {
    %c0_i32 = arith.constant 0 : i32
    %c0_i32_0 = arith.constant 0 : i32
    %c0_i32_1 = arith.constant 0 : i32
    return %c0_i32, %c0_i32_0 : i32, i32
  }
  func.func @transform_2(%arg0: i32) -> (i32, i32) {
    %c0_i32 = arith.constant 0 : i32
    %c0_i32_0 = arith.constant 0 : i32
    %c0_i32_1 = arith.constant 0 : i32
    return %c0_i32, %c0_i32_0 : i32, i32
  }
  func.func @transform_3(%arg0: i32) -> (i32, i32) {
    %c0_i32 = arith.constant 0 : i32
    %c0_i32_0 = arith.constant 0 : i32
    return %arg0, %c0_i32 : i32, i32
  }
}

</mosaic_0001>

<bundles_post_ra>
// kernel: tpu_custom_call.1
= control target key start
LH: loop header
LB: loop body
LE: loop exit
PB: predicated region body
PF: predicated region fallthrough
CT: control target
= control target key end

     0   :  { %8 = vsyncpa [#allocation3], 0  ;;  %s150_s0 = inlined_call_operand.hbm [shape: f32[1,128], index: 0, kind: input, shape index: {}]   ;;  %s151_s1 = inlined_call_operand.vmem [shape: f32[1,128], index: 1, kind: input, shape index: {}]   ;;  %s152_s2 = inlined_call_operand.vmem [shape: f32[1,128], index: 2, kind: input, shape index: {}]   ;;  %s153_s3 = inlined_call_operand.hbm [shape: f32[1,128], index: 3, kind: output, shape index: {}]  }
   0x1   :  { %9 = vsyncpa [#allocation4], 0  ;;  %s98_s12 = smov [#allocation2]   ;;  %s50_s16 = scalar_lea.hbm %s150_s0, 16 }
   0x2   :  { %s16_s13 = sshll.u32 %s98_s12, 4  ;;  %p51_p0 = scmp.ne.s32.totalorder %s150_s0, %s50_s16  ;;  %s17_s13 = int_to_ptr.vmem [resolvable:$true] %s16_s13 }
   0x3   :  { %p54_p1 = scmp.lt.u32.totalorder %s50_s16, %s150_s0 }
   0x5   :  { %p56_p2 = pnand %p54_p1, %p51_p0 }
   0x7   :  { %59 = shalt.err (!%p56_p2)
}
   0x8   :  { %s60_s21 = scalar_lea.vmem %s17_s13, 16  ;;  %s64_s22 = scalar_lea.vmem %s17_s13, 32 }
   0x9   :  { %p61_p3 = scmp.ne.s32.totalorder %s17_s13, %s60_s21  ;;  %p65_p4 = scmp.lt.s32.totalorder %s17_s13, %s17_s13 }
   0xa   :  { %p66_p5 = scmp.lt.s32.totalorder %s64_s22, %s60_s21 }
   0xc   :  { %p67_p6 = por %p66_p5, %p65_p4 }
   0xe   :  { %p68_p7 = pnand %p67_p6, %p61_p3 }
  0x10   :  { %71 = shalt.err (!%p68_p7)
}
  0x11   :  { %19 = dma.hbm_to_vmem [thread:$0]  %s150_s0, 16, %s17_s13, [#allocation3]  }
  0x12   :  { %94 = dma.done.wait [#allocation3], 16  }
  0x13   :  { %95 = vsyncadd [#allocation3], 4294967280  ;;  %s99_s25 = smov [#allocation5]   ;;  %v27_v0 = vld [vmem:[#allocation2] sm:$0x1] }
  0x14   :  { %s39_s26 = sshll.u32 %s99_s25, 4  ;;  %v28_v1 = vld [vmem:[%s151_s1] sm:$0x1]  ;;  %s40_s26 = int_to_ptr.vmem [resolvable:$true] %s39_s26 }
  0x15   :  { %v30_v2 = vld [vmem:[%s152_s2] sm:$0x1]  ;;  %v29_v3 = vmul.f32 %v28_v1, %v27_v0  ;;  %s72_s4 = scalar_lea.vmem %s40_s26, 16  ;;  %s76_s0 = scalar_lea.vmem %s40_s26, 32 }
  0x16   :  { %p73_p8 = scmp.ne.s32.totalorder %s40_s26, %s72_s4  ;;  %p77_p9 = scmp.lt.s32.totalorder %s40_s26, %s40_s26 }
  0x17   :  { %v31_v4 = vadd.f32 %v30_v2, %v29_v3  ;;  %p78_p10 = scmp.lt.s32.totalorder %s76_s0, %s72_s4 }
  0x19   :  { %32 = vst [vmem:[#allocation5] sm:$0x1] %v31_v4  ;;  %p79_p11 = por %p78_p10, %p77_p9 }
  0x1b   :  { %p80_p12 = pnand %p79_p11, %p73_p8 }
  0x1d   :  { %83 = shalt.err (!%p80_p12)
}
  0x1e   :  { %s84_s1 = scalar_lea.hbm %s153_s3, 16 }
  0x1f   :  { %p85_p13 = scmp.ne.s32.totalorder %s153_s3, %s84_s1  ;;  %p88_p0 = scmp.lt.u32.totalorder %s84_s1, %s153_s3 }
  0x21   :  { %p90_p1 = pnand %p88_p0, %p85_p13 }
  0x23   :  { %93 = shalt.err (!%p90_p1)
}
  0x24   :  { %42 = dma.vmem_to_hbm [thread:$0]  %s40_s26, 16, %s153_s3, [#allocation4]  }
  0x25   :  { %96 = dma.done.wait [#allocation4], 16  }
  0x26   :  { %97 = vsyncadd [#allocation4], 4294967280 }
  0x27   :  { %46 = vsyncpa [#allocation3], 1 }
  0x28   :  { %47 = vsyncpa [#allocation4], 1 }

</bundles_post_ra>
